<compile_context>
chip_gen: v7x
topology: tpu7x:2x2x1
jax: 0.10.0
libtpu: 0.0.40
codegen_flags: <defaults>
</compile_context>

<pallas_src>
import functools

import jax
import jax.numpy as jnp
from jax.experimental import pallas as pl
from jax.experimental.pallas import tpu as pltpu

_LANE = 128
_SUBLANE = 8
_MAX_BLOCK_ROWS = 4096  # (4096, 128) f32 block = 2 MiB; double-buffered 4 MiB


def _partial_sum_kernel(x_ref, o_ref, acc_ref, *, rows, bm, bps, needs_mask):
    """Per-split running sum over (bm, 128) blocks of the flattened input.

    grid = (n_splits, blocks_per_split).  Axis 0 is "parallel" (megacore on
    v7x), axis 1 is the sequential reduction axis.  acc_ref is a vreg-shaped
    (8, 128) f32 accumulator so every step is just VPU adds; the per-split
    partial is written once, lane-dense, on the last step.
    """
    c = pl.program_id(0)
    i = pl.program_id(1)

    @pl.when(i == 0)
    def _():
        acc_ref[...] = jnp.zeros_like(acc_ref)

    blk = x_ref[...].astype(jnp.float32)  # (bm, 128), native dtype in HBM/VMEM

    if needs_mask:
        # Zero rows beyond the logical end of the input.  Edge / duplicated
        # blocks are index-clamped in-bounds by the index_map, so the only
        # garbage data lives in rows that this mask kills.  VPU has huge
        # slack in this HBM-bound kernel, so the compare+select is free.
        valid = rows - (c * bps + i) * bm  # may be <= 0 for duplicated blocks
        row_ids = jax.lax.broadcasted_iota(jnp.int32, (bm, _LANE), 0)
        blk = jnp.where(row_ids < valid, blk, 0.0)

    # View the block as (bm//8, 8, 128) vreg tiles (no tile-boundary crossing
    # -> free view) and fold onto the accumulator with VPU adds only.
    acc_ref[...] += jnp.sum(blk.reshape(-1, _SUBLANE, _LANE), axis=0)

    @pl.when(i == pl.num_programs(1) - 1)
    def _():
        o_ref[0] = acc_ref[...]


def pallas_sum(x: jax.Array, *, max_block_rows: int = _MAX_BLOCK_ROWS) -> jax.Array:
    """Sum over all elements of `x` (any shape) via a Pallas reduction kernel."""
    n = x.size
    if n == 0:
        return jnp.float32(0.0)

    flat = x.reshape(-1)  # metadata-only for contiguous arrays; native dtype

    # Common NN shapes (multiple of 128 elements, >= 8 rows) need no copy.
    # Ragged sizes fall back to a single small zero-pad (up to 1023 elems).
    # TODO(synk): replace this fallback pad with in-kernel lane masking so
    # huge non-128-multiple tensors also avoid the one-time pad copy.
    if (n % _LANE != 0) or (n < _SUBLANE * _LANE):
        pad = (-n) % (_SUBLANE * _LANE)
        flat = jnp.pad(flat, (0, pad))

    rows = flat.shape[0] // _LANE
    x2d = flat.reshape(rows, _LANE)

    # Block rows: multiple of 8, never larger than the array (so blocks are
    # always at least partially in-bounds), capped at max_block_rows.
    bm = min(max_block_rows, (rows // _SUBLANE) * _SUBLANE)
    nb = pl.cdiv(rows, bm)  # number of logical row-blocks

    # Megacore (v7x: 2 TensorCores): split the reduction across a leading
    # "parallel" grid axis when the at-most-one duplicated edge block is
    # either absent (nb even) or amortized (nb >= 16).  On 1-TC chips the
    # extra axis just iterates sequentially (negligible overhead).
    nsplit = 2 if (nb >= 2 and (nb % 2 == 0 or nb >= 16)) else 1
    bps = pl.cdiv(nb, nsplit)  # blocks per split
    total_blocks = nsplit * bps
    needs_mask = (total_blocks * bm) != rows
    clamp = total_blocks > nb  # grid has duplicated (fully masked) blocks

    if clamp:
        def in_index_map(c, i):
            return (jnp.minimum(c * bps + i, nb - 1), 0)
    else:
        def in_index_map(c, i):
            return (c * bps + i, 0)

    kernel = functools.partial(
        _partial_sum_kernel, rows=rows, bm=bm, bps=bps, needs_mask=needs_mask
    )

    partials = pl.pallas_call(
        kernel,
        out_shape=jax.ShapeDtypeStruct((nsplit, _SUBLANE, _LANE), jnp.float32),
        grid_spec=pltpu.PrefetchScalarGridSpec(
            num_scalar_prefetch=0,
            grid=(nsplit, bps),
            in_specs=[pl.BlockSpec((bm, _LANE), in_index_map)],
            out_specs=pl.BlockSpec((1, _SUBLANE, _LANE), lambda c, i: (c, 0, 0)),
            scratch_shapes=[pltpu.VMEM((_SUBLANE, _LANE), jnp.float32)],
        ),
        compiler_params=pltpu.CompilerParams(
            dimension_semantics=("parallel", "arbitrary"),
            vmem_limit_bytes=32 * 1024 * 1024,
        ),
    )(x2d)

    # Tiny final reduce over nsplit * 8 * 128 partials (negligible vs. the
    # HBM pass over the loss tensor).
    return jnp.sum(partials)


def pallas_mean(x: jax.Array, *, max_block_rows: int = _MAX_BLOCK_ROWS) -> jax.Array:
    """Mean over all elements of `x` (reduction='mean' semantics)."""
    n = x.size
    # Divide in the wrapper: keeps the kernel free of captured constants.
    return pallas_sum(x, max_block_rows=max_block_rows) / jnp.float32(n)


class _Loss:
    """Mirrors crypten.nn.loss._Loss (minus the CrypTensor encryption shim)."""

    def __init__(self, reduction="mean", skip_forward=False):
        if reduction != "mean":
            raise NotImplementedError("reduction %s not supported" % reduction)
        self.reduction = reduction
        self.skip_forward = skip_forward

    def forward(self, *args, **kwargs):
        # TODO(synk): abstract in the reference module; concrete subclasses
        # supply the elementwise loss term and then call self.reduce(...).
        raise NotImplementedError("forward not implemented")

    def reduce(self, loss_elems):
        """Apply the configured reduction (mean) via the Pallas kernel."""
        assert self.reduction == "mean"
        return pallas_mean(loss_elems)

    def __call__(self, *args, **kwargs):
        return self.forward(*args, **kwargs)


if __name__ == "__main__":
    key = jax.random.PRNGKey(0)

    # Small NCHW-shaped per-element loss tensor, as a conv-style subclass
    # (e.g. MSE over feature maps) would produce.
    x = jax.random.normal(key, (2, 4, 16, 16), dtype=jnp.float32)
    criterion = _Loss(reduction="mean")
    out = jax.block_until_ready(criterion.reduce(x))
    ref = jnp.mean(x)
    assert jnp.allclose(out, ref, atol=1e-5, rtol=1e-5), (out, ref)

    # Ragged size (exercises the lane-pad fallback path).
    y = jax.random.normal(key, (3, 5, 7), dtype=jnp.float32)
    out2 = jax.block_until_ready(pallas_mean(y))
    assert jnp.allclose(out2, jnp.mean(y), atol=1e-5, rtol=1e-5), (out2, jnp.mean(y))

    # Multi-block, non-divisible row count (exercises the masked edge block).
    z = jax.random.normal(key, (2, 4, 16, 17), dtype=jnp.float32)  # rows = 17
    out3 = jax.block_until_ready(pallas_mean(z, max_block_rows=8))
    assert jnp.allclose(out3, jnp.mean(z), atol=1e-5, rtol=1e-5), (out3, jnp.mean(z))

    # Even multi-block count (exercises the 2-way parallel split path).
    w = jax.random.normal(key, (2, 8, 16, 16), dtype=jnp.float32)  # rows = 32
    out4 = jax.block_until_ready(pallas_mean(w, max_block_rows=8))
    assert jnp.allclose(out4, jnp.mean(w), atol=1e-5, rtol=1e-5), (out4, jnp.mean(w))

    print("KERNEL_OK")
</pallas_src>

<mosaic_0001>
module attributes {stable_mosaic.version = 11 : i64} {
  func.func @_partial_sum_kernel(%arg0: i32, %arg1: i32, %arg2: memref<16x128xf32, #tpu.memory_space<vmem>>, %arg3: memref<1x8x128xf32, #tpu.memory_space<vmem>>, %arg4: memref<8x128xf32, #tpu.memory_space<vmem>>) attributes {dimension_semantics = [#tpu.dimension_semantics<parallel>, #tpu.dimension_semantics<arbitrary>], iteration_bounds = array<i64: 1, 1>, scalar_prefetch = 0 : i64, scratch_operands = 1 : i64, tpu.core_type = #tpu.core_type<tc>, window_params = [{transform_indices = @transform_0, window_bounds = array<i64: 16, 128>}, {transform_indices = @transform_1, window_bounds = array<i64: 1, 8, 128>}]} {
    %c0_i32 = arith.constant 0 : i32
    %0 = arith.cmpi eq, %arg1, %c0_i32 : i32
    %1 = arith.extui %0 : i1 to i32
    %c0_i32_0 = arith.constant 0 : i32
    %2 = arith.cmpi ne, %1, %c0_i32_0 : i32
    scf.if %2 {
      %cst_8 = arith.constant 0.000000e+00 : f32
      %12 = vector.broadcast %cst_8 : f32 to vector<8x128xf32>
      %c0_9 = arith.constant 0 : index
      %c0_10 = arith.constant 0 : index
      %13 = vector.load %arg4[%c0_9, %c0_10] : memref<8x128xf32, #tpu.memory_space<vmem>>, vector<8x128xf32>
      tpu.vector_store %arg4[%c0_9, %c0_10], %12 {strides = array<i32>} : memref<8x128xf32, #tpu.memory_space<vmem>>, vector<8x128xf32>,
    } else {
    }
    %c0 = arith.constant 0 : index
    %c0_1 = arith.constant 0 : index
    %3 = vector.load %arg2[%c0, %c0_1] : memref<16x128xf32, #tpu.memory_space<vmem>>, vector<16x128xf32>
    %c0_2 = arith.constant 0 : index
    %c0_3 = arith.constant 0 : index
    %4 = vector.load %arg4[%c0_2, %c0_3] : memref<8x128xf32, #tpu.memory_space<vmem>>, vector<8x128xf32>
    %5 = vector.shape_cast %3 : vector<16x128xf32> to vector<2x8x128xf32>
    %cst = arith.constant dense<0.000000e+00> : vector<8x128xf32>
    %6 = vector.multi_reduction <add>, %5, %cst [0] : vector<2x8x128xf32> to vector<8x128xf32>
    %7 = arith.addf %4, %6 : vector<8x128xf32>
    %c0_4 = arith.constant 0 : index
    %c0_5 = arith.constant 0 : index
    %8 = vector.load %arg4[%c0_4, %c0_5] : memref<8x128xf32, #tpu.memory_space<vmem>>, vector<8x128xf32>
    tpu.vector_store %arg4[%c0_4, %c0_5], %7 {strides = array<i32>} : memref<8x128xf32, #tpu.memory_space<vmem>>, vector<8x128xf32>,
    %c0_i32_6 = arith.constant 0 : i32
    %9 = arith.cmpi eq, %arg1, %c0_i32_6 : i32
    %10 = arith.extui %9 : i1 to i32
    %c0_i32_7 = arith.constant 0 : i32
    %11 = arith.cmpi ne, %10, %c0_i32_7 : i32
    scf.if %11 {
      %c0_8 = arith.constant 0 : index
      %c0_9 = arith.constant 0 : index
      %12 = vector.load %arg4[%c0_8, %c0_9] : memref<8x128xf32, #tpu.memory_space<vmem>>, vector<8x128xf32>
      %c0_10 = arith.constant 0 : index
      %c0_11 = arith.constant 0 : index
      %c0_12 = arith.constant 0 : index
      %13 = vector.load %arg3[%c0_10, %c0_11, %c0_12] : memref<1x8x128xf32, #tpu.memory_space<vmem>>, vector<1x8x128xf32>
      %14 = vector.shape_cast %13 : vector<1x8x128xf32> to vector<8x128xf32>
      %15 = vector.shape_cast %12 : vector<8x128xf32> to vector<1x8x128xf32>
      tpu.vector_store %arg3[%c0_10, %c0_11, %c0_12], %15 {strides = array<i32>} : memref<1x8x128xf32, #tpu.memory_space<vmem>>, vector<1x8x128xf32>,
    } else {
    }
    return
  }
  func.func @transform_0(%arg0: i32, %arg1: i32) -> (i32, i32) {
    %c1_i32 = arith.constant 1 : i32
    %0 = arith.muli %arg0, %c1_i32 : i32
    %1 = arith.addi %0, %arg1 : i32
    %c0_i32 = arith.constant 0 : i32
    %c0_i32_0 = arith.constant 0 : i32
    return %1, %c0_i32 : i32, i32
  }
  func.func @transform_1(%arg0: i32, %arg1: i32) -> (i32, i32, i32) {
    %c0_i32 = arith.constant 0 : i32
    %c0_i32_0 = arith.constant 0 : i32
    %c0_i32_1 = arith.constant 0 : i32
    return %arg0, %c0_i32, %c0_i32_0 : i32, i32, i32
  }
}

</mosaic_0001>

<bundles_post_ra>
// kernel: tpu_custom_call.1
= control target key start
LH: loop header
LB: loop body
LE: loop exit
PB: predicated region body
PF: predicated region fallthrough
CT: control target
= control target key end

     0   :  { %6 = vsyncpa [#allocation4], 0  ;;  %s150_s0 = inlined_call_operand.hbm [shape: f32[16,128], index: 0, kind: input, shape index: {}]   ;;  %s151_s1 = inlined_call_operand.hbm [shape: f32[1,8,128], index: 1, kind: output, shape index: {}]  }
   0x1   :  { %7 = vsyncpa [#allocation5], 0  ;;  %s112_s6 = smov [#allocation3]   ;;  %s64_s10 = scalar_lea.hbm %s150_s0, 256 }
   0x2   :  { %s17_s7 = sshll.u32 %s112_s6, 4  ;;  %p65_p0 = scmp.ne.s32.totalorder %s150_s0, %s64_s10  ;;  %s18_s7 = int_to_ptr.vmem [resolvable:$true] %s17_s7 }
   0x3   :  { %p68_p1 = scmp.lt.u32.totalorder %s64_s10, %s150_s0 }
   0x5   :  { %p70_p2 = pnand %p68_p1, %p65_p0 }
   0x7   :  { %73 = shalt.err (!%p70_p2)
}
   0x8   :  { %s74_s15 = scalar_lea.vmem %s18_s7, 256  ;;  %p79_p4 = scmp.lt.s32.totalorder %s18_s7, %s18_s7 }
   0x9   :  { %p75_p3 = scmp.ne.s32.totalorder %s18_s7, %s74_s15  ;;  %p80_p5 = scmp.lt.s32.totalorder %s74_s15, %s74_s15 }
   0xb   :  { %p81_p6 = por %p80_p5, %p79_p4 }
   0xd   :  { %p82_p7 = pnand %p81_p6, %p75_p3 }
   0xf   :  { %85 = shalt.err (!%p82_p7)
}
  0x10   :  { %s113_s16 = smov 128   ;;  %s114_s17 = smov 8  }
  0x11   :  { %23 = dma.hbm_to_vmem [thread:$0]  %s150_s0, 256, %s18_s7, [#allocation4], %s113_s16, %s113_s16, %s114_s17  }
  0x12   :  { %108 = dma.done.wait [#allocation4], 256  }
  0x13   :  { %109 = vsyncadd [#allocation4], 4294967040  ;;  %s115_s20 = smov [#allocation6]   ;;  %v34_v0 = vld [vmem:[#allocation3] sm:$0xff]  ;;  %v35_v1 = vld [vmem:[#allocation3 + $0x8] sm:$0xff] }
  0x14   :  { %s51_s21 = sshll.u32 %s115_s20, 4  ;;  %v37_v2 = vadd.f32 %v35_v1, %v34_v0  ;;  %s52_s21 = int_to_ptr.vmem [resolvable:$true] %s51_s21 }
  0x15   :  { %s86_s22 = scalar_lea.vmem %s52_s21, 128  ;;  %p91_p9 = scmp.lt.s32.totalorder %s52_s21, %s52_s21 }
  0x16   :  { %44 = vst [vmem:[#allocation6] sm:$0xff] %v37_v2  ;;  %p87_p8 = scmp.ne.s32.totalorder %s52_s21, %s86_s22  ;;  %p92_p10 = scmp.lt.s32.totalorder %s86_s22, %s86_s22 }
  0x18   :  { %p93_p11 = por %p92_p10, %p91_p9 }
  0x1a   :  { %p94_p12 = pnand %p93_p11, %p87_p8 }
  0x1c   :  { %97 = shalt.err (!%p94_p12)
}
  0x1d   :  { %s98_s0 = scalar_lea.hbm %s151_s1, 128 }
  0x1e   :  { %p99_p13 = scmp.ne.s32.totalorder %s151_s1, %s98_s0  ;;  %p102_p0 = scmp.lt.u32.totalorder %s98_s0, %s151_s1 }
  0x20   :  { %p104_p1 = pnand %p102_p0, %p99_p13 }
  0x22   :  { %107 = shalt.err (!%p104_p1)
}
  0x23   :  { %54 = dma.vmem_to_hbm [thread:$0]  %s52_s21, 128, %s151_s1, [#allocation5]  }
  0x24   :  { %110 = dma.done.wait [#allocation5], 128  }
  0x25   :  { %111 = vsyncadd [#allocation5], 4294967168 }
  0x26   :  { %58 = vsyncpa [#allocation4], 1 }
  0x27   :  { %59 = vsyncpa [#allocation5], 1 }

</bundles_post_ra>
